<compile_context>
chip_gen: v6e
topology: v6e:2x2x1
jax: 0.10.0
libtpu: 0.0.40
codegen_flags: <defaults>
</compile_context>

<pallas_src>
import functools

import jax
import jax.numpy as jnp
from jax.experimental import pallas as pl
from jax.experimental.pallas import tpu as pltpu

LANE = 128


def gprgnn_kernel(pw_ref, x_ref, a_ref, w1_ref, b1_ref, w2_ref, out_ref,
                  hk_ref, acc_ref, *, K, TM):
    """One grid step = one (hop kk, row-tile i) cell.

    pw_ref : (K+1,)        f32  SMEM  propagation weights
    x_ref  : (TM, Fin_pad) bf16 VMEM  row tile of node features     (used at kk==0)
    a_ref  : (TM, N_pad)   bf16 VMEM  row tile of normalized adjacency (kk>=1)
    w1_ref : (Fin_pad, P)  bf16 VMEM  lin1 weight, augmented/padded
    b1_ref : (1, P)        f32  VMEM  lin1 bias, augmented (col H == 1)
    w2_ref : (P, C_pad)    bf16 VMEM  lin2 weight, augmented (row H == b2)
    out_ref: (TM, C_pad)   f32  VMEM  lane-dense output row tile  (written at kk==K)
    hk_ref : (2, N_pad, P) bf16 VMEM  double-buffered propagated slab (persistent scratch)
    acc_ref: (N_pad, P)    f32  VMEM  generalized-PageRank accumulator (persistent scratch)
    """
    kk = pl.program_id(0)                # 0 = lin1/init, 1..K = propagation hops
    i = pl.program_id(1)                 # row-tile index
    row0 = pl.multiple_of(i * TM, TM)
    rows = pl.ds(row0, TM)

    @pl.when(kk == 0)
    def _init():
        # slab rows = [ relu(lin1(x)) | 1 | 0 ... ]  (ones column tracks b2).
        slab = jnp.dot(x_ref[...], w1_ref[...],
                       preferred_element_type=jnp.float32) + b1_ref[...]
        slab = jnp.maximum(slab, 0.0)
        hk_ref[0, rows, :] = slab.astype(jnp.bfloat16)
        acc_ref[rows, :] = pw_ref[0] * slab

    @pl.when(kk > 0)
    def _hop():
        src = (kk + 1) % 2               # slot holding h_{kk-1}
        dst = kk % 2
        # (TM, N_pad) bf16 @ (N_pad, 128) bf16 -> f32 accumulation on the MXU.
        h_new = jnp.dot(a_ref[...], hk_ref[src],
                        preferred_element_type=jnp.float32)
        hk_ref[dst, rows, :] = h_new.astype(jnp.bfloat16)
        acc_ref[rows, :] = acc_ref[rows, :] + pw_ref[kk] * h_new

    @pl.when(kk == K)
    def _finalize():
        # lin2 (+ b2 via the ones column folded into w2_aug row H), applied once.
        out_ref[...] = jnp.dot(acc_ref[rows, :].astype(jnp.bfloat16),
                               w2_ref[...],
                               preferred_element_type=jnp.float32)


def _round_up(v, m):
    return pl.cdiv(v, m) * m


def gprgnn_forward(x, w1, b1, w2, b2, a_norm, prop_weights, *, K):
    """Pads/augments params to lane granularity and launches the tiled kernel."""
    f32, bf16 = jnp.float32, jnp.bfloat16
    N, fin = x.shape
    H = w1.shape[1]
    C = w2.shape[1]

    P = _round_up(H + 1, LANE)           # hidden + ones column, lane padded
    C_pad = _round_up(C, LANE)           # lane-dense output width
    fin_pad = _round_up(fin, LANE)
    N_pad = _round_up(N, LANE)

    # --- generation-aware VMEM budget --------------------------------------
    try:
        vmem_cap = int(pltpu.get_tpu_info().vmem_capacity_bytes)
    except Exception:                     # conservative (v7x-sized) fallback
        vmem_cap = 64 << 20
    budget = int(0.75 * vmem_cap)         # leave headroom for Mosaic scratch

    scratch_bytes = 2 * N_pad * P * 2 + N_pad * P * 4   # bf16 hk x2 + f32 acc
    weight_bytes = 2 * (fin_pad * P * 2 + P * 4 + P * C_pad * 2)

    def tile_bytes(tm):
        a_blk = 2 * tm * N_pad * 2        # double-buffered bf16 A row tiles
        x_blk = 2 * tm * fin_pad * 2
        o_blk = 2 * tm * C_pad * 4
        tmp = 3 * tm * P * 4              # h_new / acc-slice temporaries
        return a_blk + x_blk + o_blk + tmp

    # Largest row tile (multiple of 128, dividing N_pad) that fits the budget.
    TM = LANE
    cand = min(1024, N_pad)
    while cand >= LANE:
        if N_pad % cand == 0 and (scratch_bytes + weight_bytes + tile_bytes(cand)
                                  <= budget):
            TM = cand
            break
        cand -= LANE
    # TODO(synk): for graphs where even TM=128 or the hk/acc scratch exceeds
    #             the budget, additionally tile the contraction dimension
    #             (stream hk column blocks) instead of keeping it VMEM-resident.

    n_tiles = N_pad // TM
    vmem_limit = int(min(budget,
                         max(32 << 20,
                             scratch_bytes + weight_bytes + tile_bytes(TM)
                             + (8 << 20))))

    # --- padded / augmented operands (bf16 MXU operands, f32 accumulation) --
    x_pad = jnp.zeros((N_pad, fin_pad), bf16).at[:N, :fin].set(x.astype(bf16))
    a_pad = jnp.zeros((N_pad, N_pad), bf16).at[:N, :N].set(a_norm.astype(bf16))
    # TODO(synk): for large graphs build the normalized adjacency directly in
    #             bf16 (avoid holding a dense f32 copy + an extra cast pass).

    # Augmented lin1: column H produces the constant-1 bias-tracker column.
    w1_aug = jnp.zeros((fin_pad, P), bf16).at[:fin, :H].set(w1.astype(bf16))
    b1_aug = (jnp.zeros((1, P), f32)
              .at[0, :H].set(b1.reshape(-1).astype(f32))
              .at[0, H].set(1.0))
    # Augmented lin2: row H carries b2, so acc @ W2_aug == acc_h @ W2 + ones*b2.
    w2_aug = (jnp.zeros((P, C_pad), bf16)
              .at[:H, :C].set(w2.astype(bf16))
              .at[H, :C].set(b2.reshape(-1).astype(bf16)))

    pw = prop_weights.astype(f32)

    kernel = functools.partial(gprgnn_kernel, K=K, TM=TM)

    out_pad = pl.pallas_call(
        kernel,
        out_shape=jax.ShapeDtypeStruct((N_pad, C_pad), f32),
        grid=(K + 1, n_tiles),
        in_specs=[
            pl.BlockSpec(memory_space=pltpu.MemorySpace.SMEM),            # pw
            pl.BlockSpec((TM, fin_pad),
                         lambda kk, i: (jnp.where(kk == 0, i, 0), 0)),    # x rows
            pl.BlockSpec((TM, N_pad),
                         lambda kk, i: (jnp.where(kk == 0, 0, i), 0)),    # A rows
            pl.BlockSpec((fin_pad, P), lambda kk, i: (0, 0)),             # w1_aug
            pl.BlockSpec((1, P), lambda kk, i: (0, 0)),                   # b1_aug
            pl.BlockSpec((P, C_pad), lambda kk, i: (0, 0)),               # w2_aug
        ],
        out_specs=pl.BlockSpec(
            (TM, C_pad), lambda kk, i: (jnp.where(kk == K, i, 0), 0)),
        scratch_shapes=[
            pltpu.VMEM((2, N_pad, P), bf16),   # double-buffered propagated slab
            pltpu.VMEM((N_pad, P), f32),       # generalized-PageRank accumulator
        ],
        compiler_params=pltpu.CompilerParams(
            dimension_semantics=("arbitrary", "arbitrary"),
            vmem_limit_bytes=vmem_limit,
        ),
    )(pw, x_pad, a_pad, w1_aug, b1_aug, w2_aug)

    return out_pad[:N, :C]                 # slice the real rows / columns


def build_norm_adjacency(edge_index, num_nodes, dtype=jnp.float32):
    """Glue (plain JAX): matches the module exactly (degree over `row`, no self-loops).

    propagate(): out[col] += norm * x[row]  ==>  A[col, row] += norm.
    """
    row, col = edge_index[0], edge_index[1]
    deg = jnp.zeros((num_nodes,), dtype).at[row].add(1.0)
    deg_inv_sqrt = jnp.where(deg > 0, deg ** -0.5, 0.0)
    norm = deg_inv_sqrt[row] * deg_inv_sqrt[col]
    a = jnp.zeros((num_nodes, num_nodes), dtype).at[col, row].add(norm)
    return a


def gprgnn_reference(x, w1, b1, w2, b2, a_norm, prop_weights, K):
    """Pure f32 JAX reference of the original forward (eval mode)."""
    h = jnp.maximum(x @ w1 + b1, 0.0)
    h = h @ w2 + b2
    out = prop_weights[0] * h
    for k in range(1, K + 1):
        h = a_norm @ h
        out = out + prop_weights[k] * h
    return out


if __name__ == "__main__":
    # Small shapes consistent with the module's forward.
    N = 128           # number of nodes
    IN_C = 16         # in_channels
    HID = 32          # hidden_channels
    OUT_C = 4         # out_channels
    K = 10
    E = 512           # number of edges

    key = jax.random.PRNGKey(0)
    kx, ke1, ke2, kw1, kb1, kw2, kb2, kpw = jax.random.split(key, 8)

    x = jax.random.normal(kx, (N, IN_C), jnp.float32)
    row = jax.random.randint(ke1, (E,), 0, N)
    col = jax.random.randint(ke2, (E,), 0, N)
    edge_index = jnp.stack([row, col], axis=0)          # (2, E)

    # Deterministic parameter init (shapes mirror nn.Linear; weights stored transposed).
    w1 = jax.random.uniform(kw1, (IN_C, HID), jnp.float32,
                            -1.0 / IN_C ** 0.5, 1.0 / IN_C ** 0.5)
    b1 = jax.random.uniform(kb1, (HID,), jnp.float32,
                            -1.0 / IN_C ** 0.5, 1.0 / IN_C ** 0.5)
    w2 = jax.random.uniform(kw2, (HID, OUT_C), jnp.float32,
                            -1.0 / HID ** 0.5, 1.0 / HID ** 0.5)
    b2 = jax.random.uniform(kb2, (OUT_C,), jnp.float32,
                            -1.0 / HID ** 0.5, 1.0 / HID ** 0.5)

    # prop_weights: 'Random' init as in reset_parameters()
    bound = (3.0 / (K + 1)) ** 0.5
    pw = jax.random.uniform(kpw, (K + 1,), jnp.float32, -bound, bound)
    pw = pw / jnp.abs(pw).sum()

    a_norm = build_norm_adjacency(edge_index, N)

    out = gprgnn_forward(x, w1, b1, w2, b2, a_norm, pw, K=K)
    out = jax.block_until_ready(out)

    ref = gprgnn_reference(x, w1, b1.reshape(1, -1), w2, b2.reshape(1, -1),
                           a_norm, pw, K)
    assert out.shape == (N, OUT_C)
    # Tolerance accounts for bf16 adjacency / bf16 MXU operands (f32 accumulation).
    max_err = float(jnp.max(jnp.abs(out - ref)))
    assert jnp.allclose(out, ref, rtol=5e-2, atol=2e-2), (
        f"mismatch vs reference (max abs err {max_err})")

    print("KERNEL_OK")
</pallas_src>

<mosaic_0001>
module attributes {stable_mosaic.version = 11 : i64} {
  func.func @gprgnn_kernel(%arg0: i32, %arg1: i32, %arg2: memref<11xf32, #tpu.memory_space<smem>>, %arg3: memref<128x128xbf16, #tpu.memory_space<vmem>>, %arg4: memref<128x128xbf16, #tpu.memory_space<vmem>>, %arg5: memref<128x128xbf16, #tpu.memory_space<vmem>>, %arg6: memref<1x128xf32, #tpu.memory_space<vmem>>, %arg7: memref<128x128xbf16, #tpu.memory_space<vmem>>, %arg8: memref<128x128xf32, #tpu.memory_space<vmem>>, %arg9: memref<2x128x128xbf16, #tpu.memory_space<vmem>>, %arg10: memref<128x128xf32, #tpu.memory_space<vmem>>) attributes {dimension_semantics = [#tpu.dimension_semantics<arbitrary>, #tpu.dimension_semantics<arbitrary>], iteration_bounds = array<i64: 11, 1>, scalar_prefetch = 0 : i64, scratch_operands = 2 : i64, tpu.core_type = #tpu.core_type<tc>, window_params = [{transform_indices = @transform_0, window_bounds = array<i64: 11>}, {transform_indices = @transform_1, window_bounds = array<i64: 128, 128>}, {transform_indices = @transform_2, window_bounds = array<i64: 128, 128>}, {pipeline_mode = #tpu.pipeline_mode<synchronous>, transform_indices = @transform_3, window_bounds = array<i64: 128, 128>}, {pipeline_mode = #tpu.pipeline_mode<synchronous>, transform_indices = @transform_4, window_bounds = array<i64: 1, 128>}, {pipeline_mode = #tpu.pipeline_mode<synchronous>, transform_indices = @transform_5, window_bounds = array<i64: 128, 128>}, {transform_indices = @transform_6, window_bounds = array<i64: 128, 128>}]} {
    %c128_i32 = arith.constant 128 : i32
    %0 = arith.muli %arg1, %c128_i32 : i32
    %1 = tpu.assume_multiple %0, 128 : i32
    %c0_i32 = arith.constant 0 : i32
    %2 = arith.cmpi eq, %arg0, %c0_i32 : i32
    %3 = arith.extui %2 : i1 to i32
    %c0_i32_0 = arith.constant 0 : i32
    %4 = arith.cmpi ne, %3, %c0_i32_0 : i32
    scf.if %4 {
      %c0 = arith.constant 0 : index
      %c0_4 = arith.constant 0 : index
      %11 = vector.load %arg3[%c0, %c0_4] : memref<128x128xbf16, #tpu.memory_space<vmem>>, vector<128x128xbf16>
      %c0_5 = arith.constant 0 : index
      %c0_6 = arith.constant 0 : index
      %12 = vector.load %arg5[%c0_5, %c0_6] : memref<128x128xbf16, #tpu.memory_space<vmem>>, vector<128x128xbf16>
      %cst = arith.constant dense<0.000000e+00> : vector<128x128xf32>
      %13 = tpu.matmul %11, %12, %cst {dimension_numbers = #tpu.dot_dimension_numbers<[1], [0], [0], [1], [0, 0, 1, 1], [], []>} : vector<128x128xbf16>, vector<128x128xbf16>, vector<128x128xf32> -> vector<128x128xf32>
      %c0_7 = arith.constant 0 : index
      %c0_8 = arith.constant 0 : index
      %14 = vector.load %arg6[%c0_7, %c0_8] : memref<1x128xf32, #tpu.memory_space<vmem>>, vector<1x128xf32>
      %15 = vector.broadcast %14 : vector<1x128xf32> to vector<128x128xf32>
      %16 = arith.addf %13, %15 : vector<128x128xf32>
      %cst_9 = arith.constant 0.000000e+00 : f32
      %17 = vector.broadcast %cst_9 : f32 to vector<128x128xf32>
      %18 = arith.maximumf %16, %17 : vector<128x128xf32>
      %19 = arith.truncf %18 : vector<128x128xf32> to vector<128x128xbf16>
      %c0_10 = arith.constant 0 : index
      %20 = arith.index_cast %1 : i32 to index
      %c0_11 = arith.constant 0 : index
      %21 = vector.load %arg9[%c0_10, %20, %c0_11] : memref<2x128x128xbf16, #tpu.memory_space<vmem>>, vector<1x128x128xbf16>
      %22 = vector.shape_cast %21 : vector<1x128x128xbf16> to vector<128x128xbf16>
      %23 = vector.shape_cast %19 : vector<128x128xbf16> to vector<1x128x128xbf16>
      tpu.vector_store %arg9[%c0_10, %20, %c0_11], %23 {strides = array<i32>} : memref<2x128x128xbf16, #tpu.memory_space<vmem>>, vector<1x128x128xbf16>,
      %c0_12 = arith.constant 0 : index
      %24 = memref.load %arg2[%c0_12] : memref<11xf32, #tpu.memory_space<smem>>
      %25 = vector.broadcast %24 : f32 to vector<128x128xf32>
      %26 = arith.mulf %25, %18 : vector<128x128xf32>
      %27 = arith.index_cast %1 : i32 to index
      %c0_13 = arith.constant 0 : index
      %28 = vector.load %arg10[%27, %c0_13] : memref<128x128xf32, #tpu.memory_space<vmem>>, vector<128x128xf32>
      tpu.vector_store %arg10[%27, %c0_13], %26 {strides = array<i32>} : memref<128x128xf32, #tpu.memory_space<vmem>>, vector<128x128xf32>,
    } else {
    }
    %c0_i32_1 = arith.constant 0 : i32
    %5 = arith.cmpi sgt, %arg0, %c0_i32_1 : i32
    %6 = arith.extui %5 : i1 to i32
    %c0_i32_2 = arith.constant 0 : i32
    %7 = arith.cmpi ne, %6, %c0_i32_2 : i32
    scf.if %7 {
      %c1_i32 = arith.constant 1 : i32
      %11 = arith.addi %arg0, %c1_i32 : i32
      %c2_i32 = arith.constant 2 : i32
      %c0_i32_4 = arith.constant 0 : i32
      %12 = arith.cmpi eq, %c2_i32, %c0_i32_4 : i32
      %c1_i32_5 = arith.constant 1 : i32
      %13 = arith.select %12, %c1_i32_5, %c2_i32 : i32
      %14 = arith.remsi %11, %13 : i32
      %c0_i32_6 = arith.constant 0 : i32
      %15 = arith.cmpi ne, %14, %c0_i32_6 : i32
      %c0_i32_7 = arith.constant 0 : i32
      %16 = arith.cmpi slt, %14, %c0_i32_7 : i32
      %c0_i32_8 = arith.constant 0 : i32
      %17 = arith.cmpi slt, %13, %c0_i32_8 : i32
      %18 = arith.xori %16, %17 : i1
      %19 = arith.andi %18, %15 : i1
      %20 = arith.addi %14, %13 : i32
      %21 = arith.select %19, %20, %14 : i32
      %c2_i32_9 = arith.constant 2 : i32
      %c0_i32_10 = arith.constant 0 : i32
      %22 = arith.cmpi eq, %c2_i32_9, %c0_i32_10 : i32
      %c1_i32_11 = arith.constant 1 : i32
      %23 = arith.select %22, %c1_i32_11, %c2_i32_9 : i32
      %24 = arith.remsi %arg0, %23 : i32
      %c0_i32_12 = arith.constant 0 : i32
      %25 = arith.cmpi ne, %24, %c0_i32_12 : i32
      %c0_i32_13 = arith.constant 0 : i32
      %26 = arith.cmpi slt, %24, %c0_i32_13 : i32
      %c0_i32_14 = arith.constant 0 : i32
      %27 = arith.cmpi slt, %23, %c0_i32_14 : i32
      %28 = arith.xori %26, %27 : i1
      %29 = arith.andi %28, %25 : i1
      %30 = arith.addi %24, %23 : i32
      %31 = arith.select %29, %30, %24 : i32
      %c0 = arith.constant 0 : index
      %c0_15 = arith.constant 0 : index
      %32 = vector.load %arg4[%c0, %c0_15] : memref<128x128xbf16, #tpu.memory_space<vmem>>, vector<128x128xbf16>
      %33 = arith.index_cast %21 : i32 to index
      %c0_16 = arith.constant 0 : index
      %c0_17 = arith.constant 0 : index
      %34 = vector.load %arg9[%33, %c0_16, %c0_17] : memref<2x128x128xbf16, #tpu.memory_space<vmem>>, vector<1x128x128xbf16>
      %35 = vector.shape_cast %34 : vector<1x128x128xbf16> to vector<128x128xbf16>
      %cst = arith.constant dense<0.000000e+00> : vector<128x128xf32>
      %36 = tpu.matmul %32, %35, %cst {dimension_numbers = #tpu.dot_dimension_numbers<[1], [0], [0], [1], [0, 0, 1, 1], [], []>} : vector<128x128xbf16>, vector<128x128xbf16>, vector<128x128xf32> -> vector<128x128xf32>
      %37 = arith.truncf %36 : vector<128x128xf32> to vector<128x128xbf16>
      %38 = arith.index_cast %31 : i32 to index
      %39 = arith.index_cast %1 : i32 to index
      %c0_18 = arith.constant 0 : index
      %40 = vector.load %arg9[%38, %39, %c0_18] : memref<2x128x128xbf16, #tpu.memory_space<vmem>>, vector<1x128x128xbf16>
      %41 = vector.shape_cast %40 : vector<1x128x128xbf16> to vector<128x128xbf16>
      %42 = vector.shape_cast %37 : vector<128x128xbf16> to vector<1x128x128xbf16>
      tpu.vector_store %arg9[%38, %39, %c0_18], %42 {strides = array<i32>} : memref<2x128x128xbf16, #tpu.memory_space<vmem>>, vector<1x128x128xbf16>,
      %43 = arith.index_cast %1 : i32 to index
      %c0_19 = arith.constant 0 : index
      %44 = vector.load %arg10[%43, %c0_19] : memref<128x128xf32, #tpu.memory_space<vmem>>, vector<128x128xf32>
      %45 = arith.index_cast %arg0 : i32 to index
      %46 = memref.load %arg2[%45] : memref<11xf32, #tpu.memory_space<smem>>
      %47 = vector.broadcast %46 : f32 to vector<128x128xf32>
      %48 = arith.mulf %47, %36 : vector<128x128xf32>
      %49 = arith.addf %44, %48 : vector<128x128xf32>
      %50 = arith.index_cast %1 : i32 to index
      %c0_20 = arith.constant 0 : index
      %51 = vector.load %arg10[%50, %c0_20] : memref<128x128xf32, #tpu.memory_space<vmem>>, vector<128x128xf32>
      tpu.vector_store %arg10[%50, %c0_20], %49 {strides = array<i32>} : memref<128x128xf32, #tpu.memory_space<vmem>>, vector<128x128xf32>,
    } else {
    }
    %c10_i32 = arith.constant 10 : i32
    %8 = arith.cmpi eq, %arg0, %c10_i32 : i32
    %9 = arith.extui %8 : i1 to i32
    %c0_i32_3 = arith.constant 0 : i32
    %10 = arith.cmpi ne, %9, %c0_i32_3 : i32
    scf.if %10 {
      %11 = arith.index_cast %1 : i32 to index
      %c0 = arith.constant 0 : index
      %12 = vector.load %arg10[%11, %c0] : memref<128x128xf32, #tpu.memory_space<vmem>>, vector<128x128xf32>
      %13 = arith.truncf %12 : vector<128x128xf32> to vector<128x128xbf16>
      %c0_4 = arith.constant 0 : index
      %c0_5 = arith.constant 0 : index
      %14 = vector.load %arg7[%c0_4, %c0_5] : memref<128x128xbf16, #tpu.memory_space<vmem>>, vector<128x128xbf16>
      %cst = arith.constant dense<0.000000e+00> : vector<128x128xf32>
      %15 = tpu.matmul %13, %14, %cst {dimension_numbers = #tpu.dot_dimension_numbers<[1], [0], [0], [1], [0, 0, 1, 1], [], []>} : vector<128x128xbf16>, vector<128x128xbf16>, vector<128x128xf32> -> vector<128x128xf32>
      %c0_6 = arith.constant 0 : index
      %c0_7 = arith.constant 0 : index
      %16 = vector.load %arg8[%c0_6, %c0_7] : memref<128x128xf32, #tpu.memory_space<vmem>>, vector<128x128xf32>
      tpu.vector_store %arg8[%c0_6, %c0_7], %15 {strides = array<i32>} : memref<128x128xf32, #tpu.memory_space<vmem>>, vector<128x128xf32>,
    } else {
    }
    return
  }
  func.func @transform_0(%arg0: i32, %arg1: i32) -> i32 {
    %c0_i32 = arith.constant 0 : i32
    %c0_i32_0 = arith.constant 0 : i32
    return %c0_i32 : i32
  }
  func.func @transform_1(%arg0: i32, %arg1: i32) -> (i32, i32) {
    %c0_i32 = arith.constant 0 : i32
    %0 = arith.cmpi eq, %arg0, %c0_i32 : i32
    %c0_i32_0 = arith.constant 0 : i32
    %1 = arith.select %0, %arg1, %c0_i32_0 : i32
    %c0_i32_1 = arith.constant 0 : i32
    %c0_i32_2 = arith.constant 0 : i32
    return %1, %c0_i32_1 : i32, i32
  }
  func.func @transform_2(%arg0: i32, %arg1: i32) -> (i32, i32) {
    %c0_i32 = arith.constant 0 : i32
    %0 = arith.cmpi eq, %arg0, %c0_i32 : i32
    %c0_i32_0 = arith.constant 0 : i32
    %1 = arith.select %0, %c0_i32_0, %arg1 : i32
    %c0_i32_1 = arith.constant 0 : i32
    %c0_i32_2 = arith.constant 0 : i32
    return %1, %c0_i32_1 : i32, i32
  }
  func.func @transform_3(%arg0: i32, %arg1: i32) -> (i32, i32) {
    %c0_i32 = arith.constant 0 : i32
    %c0_i32_0 = arith.constant 0 : i32
    %c0_i32_1 = arith.constant 0 : i32
    return %c0_i32, %c0_i32_0 : i32, i32
  }
  func.func @transform_4(%arg0: i32, %arg1: i32) -> (i32, i32) {
    %c0_i32 = arith.constant 0 : i32
    %c0_i32_0 = arith.constant 0 : i32
    %c0_i32_1 = arith.constant 0 : i32
    return %c0_i32, %c0_i32_0 : i32, i32
  }
  func.func @transform_5(%arg0: i32, %arg1: i32) -> (i32, i32) {
    %c0_i32 = arith.constant 0 : i32
    %c0_i32_0 = arith.constant 0 : i32
    %c0_i32_1 = arith.constant 0 : i32
    return %c0_i32, %c0_i32_0 : i32, i32
  }
  func.func @transform_6(%arg0: i32, %arg1: i32) -> (i32, i32) {
    %c10_i32 = arith.constant 10 : i32
    %0 = arith.cmpi eq, %arg0, %c10_i32 : i32
    %c0_i32 = arith.constant 0 : i32
    %1 = arith.select %0, %arg1, %c0_i32 : i32
    %c0_i32_0 = arith.constant 0 : i32
    %c0_i32_1 = arith.constant 0 : i32
    return %1, %c0_i32_0 : i32, i32
  }
}

</mosaic_0001>

<bundles_post_ra>
// kernel: tpu_custom_call.1
= control target key start
LH: loop header
LB: loop body
LE: loop exit
PB: predicated region body
PF: predicated region fallthrough
CT: control target
= control target key end

     0   :  { %11 = vsyncpa [#allocation7], 0  ;;  %s2564_s0 = inlined_call_operand.hbm [shape: f32[11], index: 0, kind: input, shape index: {}]   ;;  %s2565_s1 = inlined_call_operand.hbm [shape: bf16[128,128], index: 1, kind: input, shape index: {}]   ;;  %s2566_s2 = inlined_call_operand.hbm [shape: bf16[128,128], index: 2, kind: input, shape index: {}]   ;;  %s2567_s3 = inlined_call_operand.hbm [shape: bf16[128,128], index: 3, kind: input, shape index: {}]   ;;  %s2568_s4 = inlined_call_operand.vmem [shape: f32[1,128], index: 4, kind: input, shape index: {}]   ;;  %s2569_s5 = inlined_call_operand.hbm [shape: bf16[128,128], index: 5, kind: input, shape index: {}]   ;;  %s2570_s6 = inlined_call_operand.hbm [shape: f32[128,128], index: 6, kind: output, shape index: {}]  }
   0x1   :  { %12 = vsyncpa [#allocation5], 0 }
   0x2   :  { %14 = vsyncpa [#allocation5 + $0x1], 0 }
   0x3   :  { %15 = vsyncpa [#allocation10], 0 }
   0x4   :  { %17 = vsyncpa [#allocation10 + $0x1], 0 }
   0x5   :  { %18 = vsyncpa [#allocation13], 0 }
   0x6   :  { %19 = vsyncpa [#allocation6], 0 }
   0x7   :  { %21 = vsyncpa [#allocation6 + $0x1], 0  ;;  %s2332_s21 = smov 0   ;;  %s2334_s22 = smov 0  }
   0x8   :  { %s2336_s23 = smov 0  }
   0x9 LB: > { %s2287_s24 = smov [#allocation11]   ;;  %s2348_s26 = sadd.s32 4294967295, %s2285_s23   ;;  %s2285_s23 = sphi %s2336_s23, %s27_s23   ;;  %s2281_s22 = sphi %s2334_s22, %s2575_s22   ;;  %s2277_s21 = sphi %s2332_s21, %s2574_s21  }
   0xa   : > { %s239_s25 = sshll.u32 %s2287_s24, 4  ;;  %s1543_s27 = sadd.s32 4294967294, %s2285_s23   ;;  %s240_s25 = int_to_ptr.vmem [resolvable:$true] %s239_s25 }
   0xb   : > { %p1544_p0 = scmp.ge.s32.totalorder %s2285_s23, 1  ;;  %p218_p1 = scmp.lt.s32.totalorder %s2285_s23, 12 }
   0xc   : > { %p2012_p2 = scmp.eq.s32.totalorder %s2348_s26, 0  ;;  %s39_s30 = sadd.s32 1, %s2281_s22 }
   0xd   : > { %p2354_p3 = pnand %p1544_p0, %p218_p1  ;;  %s2111_s7 = scalar_lea.vmem %s240_s25, 1024 }
   0xe   : > { %p2112_p7 = scmp.ne.s32.totalorder %s240_s25, %s2111_s7  ;;  %p2119_p10 = scmp.lt.s32.totalorder %s240_s25, %s240_s25 }
   0xf   : > { %p1991_p4 = pneg %p2354_p3  ;;  %p2120_p11 = scmp.lt.s32.totalorder %s2111_s7, %s2111_s7 }
  0x11   : > { %p2362_p5 = pnand %p2012_p2, %p1991_p4  ;;  %p2121_p12 = por %p2120_p11, %p2119_p10 }
  0x13   : > { %p2102_p6 = pneg %p2362_p5 }
  0x15   : > { %p2114_p8 = pnand %p2112_p7, %p2102_p6 }
  0x17   : > { %p2115_p9 = pneg %p2114_p8 }
  0x19   : > { %p2122_p13 = pnand %p2121_p12, %p2115_p9 }
  0x1b   : > { %2125 = shalt.err (!%p2122_p13)
}
  0x1c   : > { %s2288_s8 = smov 64   ;;  %s2289_s9 = smov 4  }
  0x1d   : > { %1997 = dma.hbm_to_vmem [thread:$0]  (!%p2362_p5), %s2567_s3, 1024, %s240_s25, [#allocation10], %s2288_s8, %s2288_s8, %s2289_s9  }
  0x1e   : > { %p41_p0 = scmp.ge.s32.totalorder %s39_s30, 11  ;;  %s2290_s12 = smov [#allocation4]  }
  0x1f   : > { %1994 = dma.hbm_to_smem (!%p2362_p5), %s2564_s0, 16, %s2290_s12, [#allocation7]  }
  0x20   : > { %s2577_s30 = smov (%p41_p0, %s39_s30), 0  ;;  %p2015_p1 = scmp.lt.s32.totalorder %s2285_s23, 11 }
  0x21   : > { %s2291_s15 = smov [#allocation12]   ;;  %p2016_p4 = scmp.eq.s32.totalorder %s2285_s23, 0 }
  0x22   : > { %s255_s16 = sshll.u32 %s2291_s15, 4  ;;  %s256_s16 = int_to_ptr.vmem [resolvable:$true] %s255_s16 }
  0x23   : > { %s2148_s17 = scalar_lea.vmem %s256_s16, 1024  ;;  %p2156_p10 = scmp.lt.s32.totalorder %s256_s16, %s256_s16 }
  0x24   : > { %p2149_p7 = scmp.ne.s32.totalorder %s256_s16, %s2148_s17  ;;  %p2157_p11 = scmp.lt.s32.totalorder %s2148_s17, %s2148_s17 }
  0x26   : > { %p2151_p8 = pnand %p2149_p7, %p2102_p6  ;;  %p2158_p12 = por %p2157_p11, %p2156_p10 }
  0x28   : > { %p2152_p9 = pneg %p2151_p8 }
  0x2a   : > { %p2159_p13 = pnand %p2158_p12, %p2152_p9 }
  0x2c   : > { %2162 = shalt.err (!%p2159_p13)
}
  0x2d   : > { %2000 = dma.hbm_to_vmem [thread:$0]  (!%p2362_p5), %s2569_s5, 1024, %s256_s16, [#allocation13], %s2288_s8, %s2288_s8, %s2289_s9  }
  0x2e   : > { %s2292_s20 = smov [#allocation8]   ;;  %p2404_p6 = pnand %p2016_p4, %p2015_p1 }
  0x2f   : > { %s282_s24 = sshll.u32 %s2292_s20, 4  ;;  %s292_s29 = sand.u32 1, %s2285_s23   ;;  %s283_s24 = int_to_ptr.vmem [resolvable:$true] %s282_s24 }
  0x30   : > { %p2165_p0 = pneg %p2404_p6  ;;  %s2174_s7 = scalar_lea.vmem %s283_s24, 1024 }
  0x31   : > { %p2175_p7 = scmp.ne.s32.totalorder %s283_s24, %s2174_s7  ;;  %s2181_s10 = scalar_lea.vmem %s283_s24, 2048 }
  0x32   : > { %p2182_p9 = scmp.lt.s32.totalorder %s283_s24, %s283_s24  ;;  %p2183_p10 = scmp.lt.s32.totalorder %s2181_s10, %s2174_s7 }
  0x33   : > { %p2177_p8 = pnand %p2175_p7, %p2165_p0 }
  0x34   : > { %p2184_p11 = por %p2183_p10, %p2182_p9 }
  0x35   : > { %p2178_p5 = pneg %p2177_p8 }
  0x37   : > { %p2185_p1 = pnand %p2184_p11, %p2178_p5 }
  0x39   : > { %2188 = shalt.err (!%p2185_p1)
}
  0x3a   : > { %2004 = dma.hbm_to_vmem [thread:$0]  (!%p2404_p6), %s2565_s1, 1024, %s283_s24, [#allocation5], %s2288_s8, %s2288_s8, %s2289_s9  }
  0x3b   : > { %s2293_s13 = smov [#allocation9]   ;;  %s293_s15 = scalar_lea.sflag [#allocation10], %s292_s29 }
  0x3c   : > { %s305_s14 = sshll.u32 %s2293_s13, 4  ;;  %s306_s14 = int_to_ptr.vmem [resolvable:$true] %s305_s14 }
  0x3d   : > { %s2200_s16 = scalar_lea.vmem %s306_s14, 1024  ;;  %s2207_s17 = scalar_lea.vmem %s306_s14, 2048 }
  0x3e   : > { %p2201_p4 = scmp.ne.s32.totalorder %s306_s14, %s2200_s16  ;;  %p2208_p7 = scmp.lt.s32.totalorder %s306_s14, %s306_s14 }
  0x3f   : > { %p2209_p8 = scmp.lt.s32.totalorder %s2207_s17, %s2200_s16 }
  0x40   : > { %p2203_p12 = pnand %p2201_p4, %p2165_p0 }
  0x41   : > { %p2210_p5 = por %p2209_p8, %p2208_p7 }
  0x42   : > { %p2204_p13 = pneg %p2203_p12 }
  0x44   : > { %p2211_p9 = pnand %p2210_p5, %p2204_p13 }
  0x46   : > { %2214 = shalt.err (!%p2211_p9)
}
  0x47   : > { %2007 = dma.hbm_to_vmem [thread:$0]  (!%p2404_p6), %s2566_s2, 1024, %s306_s14, %s293_s15, %s2288_s8, %s2288_s8, %s2289_s9  }
  0x48   : > { %317 = sbr.rel (%p2354_p3) target bundleno = 866 (0x362), region = 44 }
  0x4d   : > { %2252 = dma.done.wait (%p2012_p2), [#allocation7], 16  }
  0x4e   : > { %2254 = vsyncadd (%p2012_p2), [#allocation7], 4294967280 }
  0x4f   : > { %2256 = dma.done.wait (%p2012_p2), [#allocation5], 1024  }
  0x50   : > { %2258 = vsyncadd (%p2012_p2), [#allocation5], 4294966272  ;;  %s332_s20 = sand.u32 1, %s2348_s26  }
  0x51   : > { %s333_s24 = scalar_lea.sflag [#allocation10], %s332_s20 }
  0x52   : > { %2260 = dma.done.wait (%p2012_p2), %s333_s24, 1024  }
  0x53   : > { %2262 = vsyncadd (%p2012_p2), %s333_s24, 4294966272 }
  0x54   : > { %2264 = dma.done.wait (%p2012_p2), [#allocation10], 1024  }
  0x55   : > { %2266 = vsyncadd (%p2012_p2), [#allocation10], 4294966272 }
  0x56   : > { %2268 = dma.done.wait (%p2012_p2), [#allocation13], 1024  }
  0x57   : > { %2270 = vsyncadd (%p2012_p2), [#allocation13], 4294966272 }
  0x58   : > { %349 = sfence }
  0x59   : > { %p1557_p3 = scmp.ne.s32.totalorder %s2277_s21, 0 }
  0x5a   : > { %s726_s28 = sld [smem:[#allocation4]] (!%p1557_p3) }
  0x5b   : > { %393 = sbr.rel (%p1557_p3) target bundleno = 345 (0x159), region = 68 }
  0x60   : > { %v2060_v0 = vld [vmem:[#allocation11 + $0x38] sm:$0xff]   ;;  %v2061_v1 = vld [vmem:[#allocation11 + $0x30] sm:$0xff]   ;;  %v2062_v2 = vld [vmem:[#allocation11 + $0x28] sm:$0xff]   ;;  %v2464_v21 = vstv %s726_s28 }
  0x61   : > { %1823 = vmatprep.subr.bf16.mxu0 %v2060_v0  ;;  %1919 = vmatprep.subr.bf16.mxu1 %v2060_v0  ;;  %v2063_v3 = vld [vmem:[#allocation11 + $0x20] sm:$0xff]   ;;  %v2064_v6 = vld [vmem:[#allocation11 + $0x18] sm:$0xff]   ;;  %v2065_v7 = vld [vmem:[#allocation11 + $0x10] sm:$0xff]  }
  0x62   : > { %1824 = vmatpush3.bf16.msra.mxu0 %v2060_v0  ;;  %1927 = vmatpush3.bf16.msra.mxu1 %v2060_v0  ;;  %v2068_v4 = vld [vmem:[#allocation8] sm:$0xff]   ;;  %v2066_v8 = vld [vmem:[#allocation11 + $0x8] sm:$0xff]   ;;  %v2072_v12 = vld [vmem:[#allocation8 + $0x10] sm:$0xff]  }
  0x63   : > { %1825 = vmatprep.subr.bf16.mxu0 %v2061_v1  ;;  %1920 = vmatprep.subr.bf16.mxu1 %v2061_v1  ;;  %v2069_v5 = vld [vmem:[#allocation8 + $0x20] sm:$0xff]   ;;  %v2070_v10 = vld [vmem:[#allocation8 + $0x8] sm:$0xff]   ;;  %v2073_v13 = vld [vmem:[#allocation8 + $0x30] sm:$0xff]  }
  0x64   : > { %1839 = vmatprep.mubr.bf16.mxu0 %v2068_v4  ;;  %1847 = vmatprep.mubr.bf16.mxu1 %v2069_v5  ;;  %v2067_v9 = vld [vmem:[#allocation11] sm:$0xff]   ;;  %v2071_v11 = vld [vmem:[#allocation8 + $0x28] sm:$0xff]   ;;  %v2074_v14 = vld [vmem:[#allocation8 + $0x18] sm:$0xff]  }
  0x65   : > { %v2075_v15 = vld [vmem:[#allocation8 + $0x38] sm:$0xff]   ;;  %v2460_v16 = vld [vmem:[%s2568_s4] ss:$0 sm:$0xff] }
  0x66   : > { %1826 = vmatpush3.bf16.msra.mxu0 %v2061_v1  ;;  %1928 = vmatpush3.bf16.msra.mxu1 %v2061_v1 }
  0x67   : > { %1827 = vmatprep.subr.bf16.mxu0 %v2062_v2  ;;  %1921 = vmatprep.subr.bf16.mxu1 %v2062_v2 }
  0x6a   : > { %1828 = vmatpush3.bf16.msra.mxu0 %v2062_v2  ;;  %1929 = vmatpush3.bf16.msra.mxu1 %v2062_v2 }
  0x6b   : > { %1829 = vmatprep.subr.bf16.mxu0 %v2063_v3  ;;  %1922 = vmatprep.subr.bf16.mxu1 %v2063_v3 }
  0x6e   : > { %1830 = vmatpush3.bf16.msra.mxu0 %v2063_v3  ;;  %1930 = vmatpush3.bf16.msra.mxu1 %v2063_v3 }
  0x6f   : > { %1831 = vmatprep.subr.bf16.mxu0 %v2064_v6  ;;  %1923 = vmatprep.subr.bf16.mxu1 %v2064_v6 }
  0x72   : > { %1832 = vmatpush3.bf16.msra.mxu0 %v2064_v6  ;;  %1931 = vmatpush3.bf16.msra.mxu1 %v2064_v6 }
  0x73   : > { %1833 = vmatprep.subr.bf16.mxu0 %v2065_v7  ;;  %1924 = vmatprep.subr.bf16.mxu1 %v2065_v7 }
  0x76   : > { %1834 = vmatpush3.bf16.msra.mxu0 %v2065_v7  ;;  %1932 = vmatpush3.bf16.msra.mxu1 %v2065_v7 }
  0x77   : > { %1835 = vmatprep.subr.bf16.mxu0 %v2066_v8  ;;  %1925 = vmatprep.subr.bf16.mxu1 %v2066_v8 }
  0x7a   : > { %1836 = vmatpush3.bf16.msra.mxu0 %v2066_v8  ;;  %1933 = vmatpush3.bf16.msra.mxu1 %v2066_v8 }
  0x7b   : > { %1837 = vmatprep.subr.bf16.mxu0 %v2067_v9  ;;  %1926 = vmatprep.subr.bf16.mxu1 %v2067_v9 }
  0x7e   : > { %1838 = vmatpush3.bf16.msra.mxu0 %v2067_v9  ;;  %1934 = vmatpush3.bf16.msra.mxu1 %v2067_v9 }
  0x81   : > { %1840 = vmatmul.mubr.bf16.vlgmr.msra.gmra.mxu0 %v2070_v10  ;;  %1848 = vmatmul.mubr.bf16.vlgmr.msra.gmra.mxu1 %v2071_v11 }
  0x82   : > { %1843 = vmatprep.mubr.bf16.mxu0 %v2072_v12  ;;  %1851 = vmatprep.mubr.bf16.mxu1 %v2073_v13 }
  0x89   : > { %1844 = vmatmul.mubr.bf16.gmra.mxu0 %v2074_v14  ;;  %1852 = vmatmul.mubr.bf16.gmra.mxu1 %v2075_v15 }
 0x141   : > { %v1841_v17 = vpop.f32.mrf.mxu0  ;;  %v1849_v18 = vpop.f32.mrf.mxu1 }
 0x142   : > { %v572_v19 = vadd.f32 %v1841_v17, %v2460_v16  ;;  %v604_v20 = vadd.f32 %v1849_v18, %v2460_v16 }
 0x143   : > { %v563_v22 = vpop.f32.mrf.mxu0  ;;  %v595_v23 = vpop.f32.mrf.mxu1 }
 0x144   : > { %v628_v24 = vmax.f32 %v572_v19, 0.0  ;;  %v636_v25 = vmax.f32 %v604_v20, 0.0  ;;  %v564_v26 = vadd.f32 %v2460_v16, %v563_v22  ;;  %v596_v27 = vadd.f32 %v2460_v16, %v595_v23 }
 0x145   : > { %v1842_v28 = vpop.f32.mrf.mxu0  ;;  %v1850_v29 = vpop.f32.mrf.mxu1 }
 0x146   : > { %v730_v30 = vmul.f32 %v2464_v21, %v628_v24  ;;  %v738_v31 = vmul.f32 %v2464_v21, %v636_v25  ;;  %v626_v32 = vmax.f32 %v564_v26, 0.0  ;;  %v634_v33 = vmax.f32 %v596_v27, 0.0 }
 0x147   : > { %v575_v34 = vadd.f32 %v1842_v28, %v2460_v16  ;;  %v607_v35 = vadd.f32 %v1850_v29, %v2460_v16  ;;  %v566_v36 = vpop.f32.mrf.mxu0  ;;  %v598_v37 = vpop.f32.mrf.mxu1 }
 0x148   : > { %747 = vst [vmem:[#allocation3 + $0x58] sm:$0xff] %v730_v30  ;;  %755 = vst [vmem:[#allocation3 + $0x10] sm:$0xff] %v738_v31  ;;  %v728_v38 = vmul.f32 %v2464_v21, %v626_v32  ;;  %v736_v39 = vmul.f32 %v2464_v21, %v634_v33  ;;  %v567_v40 = vadd.f32 %v2460_v16, %v566_v36 }
 0x149   : > { %v599_v41 = vadd.f32 %v2460_v16, %v598_v37  ;;  %v629_v42 = vmax.f32 %v575_v34, 0.0  ;;  %v637_v43 = vmax.f32 %v607_v35, 0.0  ;;  %v1845_v44 = vpop.f32.mrf.mxu0  ;;  %v1853_v45 = vpop.f32.mrf.mxu1 }
 0x14a   : > { %745 = vst [vmem:[#allocation3 + $0x30] sm:$0xff] %v728_v38  ;;  %753 = vst [vmem:[#allocation3 + $0x40] sm:$0xff] %v736_v39  ;;  %v627_v46 = vmax.f32 %v567_v40, 0.0  ;;  %v588_v48 = vadd.f32 %v1845_v44, %v2460_v16  ;;  %v620_v49 = vadd.f32 %v1853_v45, %v2460_v16 }
 0x14b   : > { %v635_v47 = vmax.f32 %v599_v41, 0.0  ;;  %v1689_v50 = vpack.c.bf16 %v629_v42, %v628_v24  ;;  %v731_v51 = vmul.f32 %v2464_v21, %v629_v42  ;;  %v1709_v52 = vpack.c.bf16 %v637_v43, %v636_v25  ;;  %v579_v54 = vpop.f32.mrf.mxu0  ;;  %v611_v55 = vpop.f32.mrf.mxu1 }
 0x14c   : > { %v739_v53 = vmul.f32 %v2464_v21, %v637_v43  ;;  %v1684_v56 = vpack.c.bf16 %v627_v46, %v626_v32  ;;  %v729_v57 = vmul.f32 %v2464_v21, %v627_v46  ;;  %v632_v60 = vmax.f32 %v588_v48, 0.0 }
 0x14d   : > { %v1704_v58 = vpack.c.bf16 %v635_v47, %v634_v33  ;;  %v737_v59 = vmul.f32 %v2464_v21, %v635_v47  ;;  %1761 = vst [vmem:[#allocation2 + $0x8] sm:$0xff] %v1689_v50   ;;  %748 = vst [vmem:[#allocation3 + $0x18] sm:$0xff] %v731_v51  ;;  %v640_v61 = vmax.f32 %v620_v49, 0.0  ;;  %v580_v62 = vadd.f32 %v2460_v16, %v579_v54  ;;  %v1846_v0 = vpop.f32.mrf.mxu0  ;;  %v1854_v1 = vpop.f32.mrf.mxu1 }
 0x14e   : > { %1765 = vst [vmem:[#allocation2 + $0x28] sm:$0xff] %v1709_v52   ;;  %756 = vst [vmem:[#allocation3 + $0x38] sm:$0xff] %v739_v53  ;;  %v612_v63 = vadd.f32 %v2460_v16, %v611_v55  ;;  %v591_v2 = vadd.f32 %v1846_v0, %v2460_v16  ;;  %v623_v3 = vadd.f32 %v1854_v1, %v2460_v16 }
 0x14f   : > { %1685 = vst [vmem:[#allocation2] sm:$0xff] %v1684_v56   ;;  %746 = vst [vmem:[#allocation3] sm:$0xff] %v729_v57  ;;  %v734_v4 = vmul.f32 %v2464_v21, %v632_v60  ;;  %v742_v5 = vmul.f32 %v2464_v21, %v640_v61  ;;  %v630_v6 = vmax.f32 %v580_v62, 0.0  ;;  %v582_v8 = vpop.f32.mrf.mxu0  ;;  %v614_v9 = vpop.f32.mrf.mxu1 }
 0x150   : > { %1764 = vst [vmem:[#allocation2 + $0x20] sm:$0xff] %v1704_v58   ;;  %754 = vst [vmem:[#allocation3 + $0x20] sm:$0xff] %v737_v59  ;;  %v638_v7 = vmax.f32 %v612_v63, 0.0  ;;  %v633_v10 = vmax.f32 %v591_v2, 0.0  ;;  %v641_v11 = vmax.f32 %v623_v3, 0.0  ;;  %v583_v12 = vadd.f32 %v2460_v16, %v582_v8 }
 0x151   : > { %v615_v13 = vadd.f32 %v2460_v16, %v614_v9  ;;  %751 = vst [vmem:[#allocation3 + $0x8] sm:$0xff] %v734_v4  ;;  %759 = vst [vmem:[#allocation3 + $0x78] sm:$0xff] %v742_v5  ;;  %v732_v14 = vmul.f32 %v2464_v21, %v630_v6 }
 0x152   : > { %v740_v15 = vmul.f32 %v2464_v21, %v638_v7  ;;  %v1699_v17 = vpack.c.bf16 %v633_v10, %v632_v60  ;;  %v735_v18 = vmul.f32 %v2464_v21, %v633_v10  ;;  %v1719_v19 = vpack.c.bf16 %v641_v11, %v640_v61 }
 0x153   : > { %v743_v20 = vmul.f32 %v2464_v21, %v641_v11  ;;  %749 = vst [vmem:[#allocation3 + $0x50] sm:$0xff] %v732_v14  ;;  %v631_v22 = vmax.f32 %v583_v12, 0.0  ;;  %v639_v23 = vmax.f32 %v615_v13, 0.0 }
 0x154   : > { %757 = vst [vmem:[#allocation3 + $0x60] sm:$0xff] %v740_v15  ;;  %1763 = vst [vmem:[#allocation2 + $0x18] sm:$0xff] %v1699_v17  }
 0x155   : > { %752 = vst [vmem:[#allocation3 + $0x48] sm:$0xff] %v735_v18  ;;  %1767 = vst [vmem:[#allocation2 + $0x38] sm:$0xff] %v1719_v19   ;;  %v1694_v16 = vpack.c.bf16 %v631_v22, %v630_v6  ;;  %v733_v24 = vmul.f32 %v2464_v21, %v631_v22  ;;  %v1714_v25 = vpack.c.bf16 %v639_v23, %v638_v7 }
 0x156   : > { %760 = vst [vmem:[#allocation3 + $0x28] sm:$0xff] %v743_v20  ;;  %v741_v26 = vmul.f32 %v2464_v21, %v639_v23 }
 0x157   : > { %1762 = vst [vmem:[#allocation2 + $0x10] sm:$0xff] %v1694_v16   ;;  %750 = vst [vmem:[#allocation3 + $0x68] sm:$0xff] %v733_v24 }
 0x158   : > { %1766 = vst [vmem:[#allocation2 + $0x30] sm:$0xff] %v1714_v25   ;;  %758 = vst [vmem:[#allocation3 + $0x70] sm:$0xff] %v741_v26 }
 0x159 PF: > { %p1591_p2 = scmp.le.s32.totalorder %s2277_s21, 0 }
 0x15a   : > { %s765_s25 = sadd.s32 (!%p1591_p2), 1, %s2277_s21  ;;  %s779_s15 = ssub.s32 (!%p1591_p2), 0, %s2277_s21 }
 0x15b   : > { %764 = sbr.rel (%p1591_p2) target bundleno = 604 (0x25c), region = 72  ;;  %p766_p6 = scmp.lt.s32.totalorder (!%p1591_p2), %s765_s25, 0 }
 0x15c   : > { %s767_s29 = ssub.s32 (!%p1591_p2), 0, %s765_s25  ;;  %s1595_s16 = smin.u32 (!%p1591_p2), %s2277_s21, %s779_s15 }
 0x15d   : > { %s1592_s7 = smin.u32 (!%p1591_p2), %s767_s29, %s765_s25  ;;  %s781_s17 = sand.u32 (!%p1591_p2), 1, %s1595_s16  }
 0x15e   : > { %s769_s10 = sand.u32 (!%p1591_p2), 1, %s1592_s7   ;;  %p778_p10 = scmp.lt.s32.totalorder (!%p1591_p2), %s2277_s21, 0 }
 0x15f   : > { %s770_s11 = ssub.s32 (!%p1591_p2), 0, %s769_s10  ;;  %s782_s18 = ssub.s32 (!%p1591_p2), 0, %s781_s17 }
 0x160   : > { %v2084_v27 = vld [vmem:[#allocation9] sm:$0xff]   ;;  %s2579_s11 = smov (!%p766_p6, %s770_s11), %s769_s10  ;;  %v2086_v36 = vld [vmem:[#allocation9 + $0x8] sm:$0xff]   ;;  %v2088_v38 = vld [vmem:[#allocation9 + $0x10] sm:$0xff]   ;;  %s2583_s18 = smov (!%p778_p10, %s782_s18), %s781_s17 }
 0x161   : > { %1871 = vmatprep.mubr.bf16.mxu0 %v2084_v27  ;;  %v2085_v28 = vld [vmem:[#allocation9 + $0x20] sm:$0xff]   ;;  %p1594_p0 = scmp.lt.s32.totalorder %s2579_s11, 0  ;;  %s776_s12 = sadd.s32 2, %s2579_s11  ;;  %v2087_v37 = vld [vmem:[#allocation9 + $0x28] sm:$0xff]   ;;  %v2089_v39 = vld [vmem:[#allocation9 + $0x30] sm:$0xff]  }
 0x162   : > { %1879 = vmatprep.mubr.bf16.mxu1 %v2085_v28  ;;  %v2090_v40 = vld [vmem:[#allocation9 + $0x18] sm:$0xff]   ;;  %s1121_s19 = sld [smem:[#allocation4 + %s2277_s21]]  ;;  %p1597_p11 = scmp.lt.s32.totalorder %s2583_s18, 0  ;;  %v1115_v46 = vld [vmem:[#allocation3 + $0x10] sm:$0xff]  ;;  %v1113_v52 = vld [vmem:[#allocation3 + $0x40] sm:$0xff] }
 0x163   : > { %s2581_s12 = smov (!%p1594_p0, %s776_s12), %s2579_s11  ;;  %v2091_v41 = vld [vmem:[#allocation9 + $0x38] sm:$0xff]   ;;  %s788_s20 = sadd.s32 2, %s2583_s18  ;;  %v1105_v50 = vld [vmem:[#allocation3 + $0x30] sm:$0xff]  ;;  %v1106_v4 = vld [vmem:[#allocation3] sm:$0xff] }
 0x164   : > { %s1663_s13 = sshll.u32 %s2581_s12, 6  ;;  %s2585_s20 = smov (!%p1597_p11, %s788_s20), %s2583_s18  ;;  %v1107_v44 = vld [vmem:[#allocation3 + $0x58] sm:$0xff]  ;;  %v1114_v10 = vld [vmem:[#allocation3 + $0x20] sm:$0xff]  ;;  %v1111_v14 = vld [vmem:[#allocation3 + $0x8] sm:$0xff] }
 0x165   : > { %s2498_s14 = scalar_lea.vmem [#allocation2], %s1663_s13  ;;  %s1680_s24 = sshll.u32 %s2585_s20, 6  ;;  %v1108_v58 = vld [vmem:[#allocation3 + $0x18] sm:$0xff]  ;;  %v1109_v16 = vld [vmem:[#allocation3 + $0x50] sm:$0xff]  ;;  %v1117_v25 = vld [vmem:[#allocation3 + $0x60] sm:$0xff] }
 0x166   : > { %v2076_v21 = vld [vmem:[%s2498_s14 + $0x38] sm:$0xff]   ;;  %v2077_v29 = vld [vmem:[%s2498_s14 + $0x30] sm:$0xff]   ;;  %v2078_v30 = vld [vmem:[%s2498_s14 + $0x28] sm:$0xff]   ;;  %s2523_s28 = scalar_lea.vmem [#allocation2], %s1680_s24 }
 0x167   : > { %1855 = vmatprep.subr.bf16.mxu0 %v2076_v21  ;;  %1935 = vmatprep.subr.bf16.mxu1 %v2076_v21  ;;  %v2079_v31 = vld [vmem:[%s2498_s14 + $0x20] sm:$0xff]   ;;  %v2080_v32 = vld [vmem:[%s2498_s14 + $0x18] sm:$0xff]   ;;  %v2081_v33 = vld [vmem:[%s2498_s14 + $0x10] sm:$0xff]  }
 0x168   : > { %1856 = vmatpush3.bf16.msra.mxu0 %v2076_v21  ;;  %1943 = vmatpush3.bf16.msra.mxu1 %v2076_v21  ;;  %v2082_v34 = vld [vmem:[%s2498_s14 + $0x8] sm:$0xff]   ;;  %v2083_v35 = vld [vmem:[%s2498_s14] sm:$0xff]   ;;  %v2514_v42 = vstv %s1121_s19  ;;  %v1116_v0 = vld [vmem:[#allocation3 + $0x38] sm:$0xff] }
 0x169   : > { %1857 = vmatprep.subr.bf16.mxu0 %v2077_v29  ;;  %1936 = vmatprep.subr.bf16.mxu1 %v2077_v29  ;;  %v1119_v17 = vld [vmem:[#allocation3 + $0x78] sm:$0xff] }
 0x16c   : > { %1858 = vmatpush3.bf16.msra.mxu0 %v2077_v29  ;;  %1944 = vmatpush3.bf16.msra.mxu1 %v2077_v29 }
 0x16d   : > { %1859 = vmatprep.subr.bf16.mxu0 %v2078_v30  ;;  %1937 = vmatprep.subr.bf16.mxu1 %v2078_v30 }
 0x170   : > { %1860 = vmatpush3.bf16.msra.mxu0 %v2078_v30  ;;  %1945 = vmatpush3.bf16.msra.mxu1 %v2078_v30  ;;  %v1112_v30 = vld [vmem:[#allocation3 + $0x48] sm:$0xff] }
 0x171   : > { %1861 = vmatprep.subr.bf16.mxu0 %v2079_v31  ;;  %1938 = vmatprep.subr.bf16.mxu1 %v2079_v31 }
 0x174   : > { %1862 = vmatpush3.bf16.msra.mxu0 %v2079_v31  ;;  %1946 = vmatpush3.bf16.msra.mxu1 %v2079_v31 }
 0x175   : > { %1863 = vmatprep.subr.bf16.mxu0 %v2080_v32  ;;  %1939 = vmatprep.subr.bf16.mxu1 %v2080_v32 }
 0x178   : > { %1864 = vmatpush3.bf16.msra.mxu0 %v2080_v32  ;;  %1947 = vmatpush3.bf16.msra.mxu1 %v2080_v32 }
 0x179   : > { %1865 = vmatprep.subr.bf16.mxu0 %v2081_v33  ;;  %1940 = vmatprep.subr.bf16.mxu1 %v2081_v33 }
 0x17c   : > { %1866 = vmatpush3.bf16.msra.mxu0 %v2081_v33  ;;  %1948 = vmatpush3.bf16.msra.mxu1 %v2081_v33 }
 0x17d   : > { %1867 = vmatprep.subr.bf16.mxu0 %v2082_v34  ;;  %1941 = vmatprep.subr.bf16.mxu1 %v2082_v34 }
 0x180   : > { %1868 = vmatpush3.bf16.msra.mxu0 %v2082_v34  ;;  %1949 = vmatpush3.bf16.msra.mxu1 %v2082_v34 }
 0x181   : > { %1869 = vmatprep.subr.bf16.mxu0 %v2083_v35  ;;  %1942 = vmatprep.subr.bf16.mxu1 %v2083_v35 }
 0x184   : > { %1870 = vmatpush3.bf16.msra.mxu0 %v2083_v35  ;;  %1950 = vmatpush3.bf16.msra.mxu1 %v2083_v35 }
 0x187   : > { %1872 = vmatmul.mubr.bf16.vlgmr.msra.gmra.mxu0 %v2086_v36  ;;  %1880 = vmatmul.mubr.bf16.vlgmr.msra.gmra.mxu1 %v2087_v37  ;;  %v1120_v36 = vld [vmem:[#allocation3 + $0x28] sm:$0xff] }
 0x188   : > { %1875 = vmatprep.mubr.bf16.mxu0 %v2088_v38  ;;  %1883 = vmatprep.mubr.bf16.mxu1 %v2089_v39 }
 0x18f   : > { %1876 = vmatmul.mubr.bf16.gmra.mxu0 %v2090_v40  ;;  %1884 = vmatmul.mubr.bf16.gmra.mxu1 %v2091_v41  ;;  %v1110_v40 = vld [vmem:[#allocation3 + $0x68] sm:$0xff] }
 0x247   : > { %v1873_v43 = vpop.f32.mrf.mxu0  ;;  %v1881_v45 = vpop.f32.mrf.mxu1 }
 0x248   : > { %v1125_v47 = vmul.f32 %v1873_v43, %v2514_v42  ;;  %v1133_v48 = vmul.f32 %v1881_v45, %v2514_v42 }
 0x249   : > { %v955_v49 = vpop.f32.mrf.mxu0  ;;  %v987_v51 = vpop.f32.mrf.mxu1 }
 0x24a   : > { %v1141_v53 = vadd.f32 %v1125_v47, %v1107_v44  ;;  %v1149_v54 = vadd.f32 %v1133_v48, %v1115_v46  ;;  %v1123_v55 = vmul.f32 %v2514_v42, %v955_v49  ;;  %v1131_v56 = vmul.f32 %v2514_v42, %v987_v51  ;;  %v1118_v47 = vld [vmem:[#allocation3 + $0x70] sm:$0xff] }
 0x24b   : > { %v1874_v57 = vpop.f32.mrf.mxu0  ;;  %v1882_v59 = vpop.f32.mrf.mxu1 }
 0x24c   : > { %1157 = vst [vmem:[#allocation3 + $0x58] sm:$0xff] %v1141_v53  ;;  %1165 = vst [vmem:[#allocation3 + $0x10] sm:$0xff] %v1149_v54  ;;  %v1139_v60 = vadd.f32 %v1123_v55, %v1105_v50  ;;  %v1147_v61 = vadd.f32 %v1131_v56, %v1113_v52  ;;  %v1729_v62 = vpack.c.bf16 %v1874_v57, %v1873_v43 }
 0x24d   : > { %v1126_v63 = vmul.f32 %v1874_v57, %v2514_v42  ;;  %v1749_v1 = vpack.c.bf16 %v1882_v59, %v1881_v45  ;;  %v1134_v2 = vmul.f32 %v1882_v59, %v2514_v42  ;;  %v958_v3 = vpop.f32.mrf.mxu0  ;;  %v990_v5 = vpop.f32.mrf.mxu1 }
 0x24e   : > { %1155 = vst [vmem:[#allocation3 + $0x30] sm:$0xff] %v1139_v60  ;;  %1163 = vst [vmem:[#allocation3 + $0x40] sm:$0xff] %v1147_v61  ;;  %v1724_v7 = vpack.c.bf16 %v958_v3, %v955_v49  ;;  %v1124_v8 = vmul.f32 %v2514_v42, %v958_v3  ;;  %v1744_v9 = vpack.c.bf16 %v990_v5, %v987_v51 }
 0x24f   : > { %1768 = vst [vmem:[%s2523_s28 + $0x8] sm:$0xff] %v1729_v62   ;;  %v1142_v6 = vadd.f32 %v1126_v63, %v1108_v58  ;;  %1772 = vst [vmem:[%s2523_s28 + $0x28] sm:$0xff] %v1749_v1   ;;  %v1150_v11 = vadd.f32 %v1134_v2, %v1116_v0  ;;  %v1132_v12 = vmul.f32 %v2514_v42, %v990_v5  ;;  %v1877_v13 = vpop.f32.mrf.mxu0  ;;  %v1885_v15 = vpop.f32.mrf.mxu1 }
 0x250   : > { %1725 = vst [vmem:[%s2523_s28] sm:$0xff] %v1724_v7   ;;  %v1140_v18 = vadd.f32 %v1124_v8, %v1106_v4  ;;  %1771 = vst [vmem:[%s2523_s28 + $0x20] sm:$0xff] %v1744_v9   ;;  %v1129_v19 = vmul.f32 %v1877_v13, %v2514_v42  ;;  %v1137_v20 = vmul.f32 %v1885_v15, %v2514_v42 }
 0x251   : > { %1158 = vst [vmem:[#allocation3 + $0x18] sm:$0xff] %v1142_v6  ;;  %1166 = vst [vmem:[#allocation3 + $0x38] sm:$0xff] %v1150_v11  ;;  %v1148_v22 = vadd.f32 %v1132_v12, %v1114_v10  ;;  %v971_v23 = vpop.f32.mrf.mxu0  ;;  %v1003_v24 = vpop.f32.mrf.mxu1 }
 0x252   : > { %1156 = vst [vmem:[#allocation3] sm:$0xff] %v1140_v18  ;;  %v1145_v26 = vadd.f32 %v1129_v19, %v1111_v14  ;;  %v1153_v27 = vadd.f32 %v1137_v20, %v1119_v17  ;;  %v1127_v28 = vmul.f32 %v2514_v42, %v971_v23  ;;  %v1135_v21 = vmul.f32 %v2514_v42, %v1003_v24 }
 0x253   : > { %1164 = vst [vmem:[#allocation3 + $0x20] sm:$0xff] %v1148_v22  ;;  %v1878_v29 = vpop.f32.mrf.mxu0  ;;  %v1886_v31 = vpop.f32.mrf.mxu1 }
 0x254   : > { %1161 = vst [vmem:[#allocation3 + $0x8] sm:$0xff] %v1145_v26  ;;  %1169 = vst [vmem:[#allocation3 + $0x78] sm:$0xff] %v1153_v27  ;;  %v1143_v32 = vadd.f32 %v1127_v28, %v1109_v16  ;;  %v1151_v33 = vadd.f32 %v1135_v21, %v1117_v25  ;;  %v1739_v34 = vpack.c.bf16 %v1878_v29, %v1877_v13 }
 0x255   : > { %v1130_v35 = vmul.f32 %v1878_v29, %v2514_v42  ;;  %v1759_v37 = vpack.c.bf16 %v1886_v31, %v1885_v15  ;;  %v1138_v38 = vmul.f32 %v1886_v31, %v2514_v42  ;;  %v974_v39 = vpop.f32.mrf.mxu0  ;;  %v1006_v41 = vpop.f32.mrf.mxu1 }
 0x256   : > { %1159 = vst [vmem:[#allocation3 + $0x50] sm:$0xff] %v1143_v32  ;;  %1167 = vst [vmem:[#allocation3 + $0x60] sm:$0xff] %v1151_v33  ;;  %v1734_v44 = vpack.c.bf16 %v974_v39, %v971_v23  ;;  %v1128_v45 = vmul.f32 %v2514_v42, %v974_v39  ;;  %v1754_v46 = vpack.c.bf16 %v1006_v41, %v1003_v24 }
 0x257   : > { %1770 = vst [vmem:[%s2523_s28 + $0x18] sm:$0xff] %v1739_v34   ;;  %v1146_v43 = vadd.f32 %v1130_v35, %v1112_v30  ;;  %1774 = vst [vmem:[%s2523_s28 + $0x38] sm:$0xff] %v1759_v37   ;;  %v1154_v48 = vadd.f32 %v1138_v38, %v1120_v36  ;;  %v1136_v49 = vmul.f32 %v2514_v42, %v1006_v41 }
 0x258   : > { %1769 = vst [vmem:[%s2523_s28 + $0x10] sm:$0xff] %v1734_v44   ;;  %v1144_v50 = vadd.f32 %v1128_v45, %v1110_v40  ;;  %1773 = vst [vmem:[%s2523_s28 + $0x30] sm:$0xff] %v1754_v46  }
 0x259   : > { %1162 = vst [vmem:[#allocation3 + $0x48] sm:$0xff] %v1146_v43  ;;  %1170 = vst [vmem:[#allocation3 + $0x28] sm:$0xff] %v1154_v48  ;;  %v1152_v51 = vadd.f32 %v1136_v49, %v1118_v47 }
 0x25a   : > { %1160 = vst [vmem:[#allocation3 + $0x68] sm:$0xff] %v1144_v50 }
 0x25b   : > { %1168 = vst [vmem:[#allocation3 + $0x70] sm:$0xff] %v1152_v51 }
 0x25c PF: > { %p1634_p1 = scmp.ne.s32.totalorder %s2277_s21, 10 }
 0x25e   : > { %1174 = sbr.rel (%p1634_p1) target bundleno = 852 (0x354), region = 76 }
 0x263   : > { %v2092_v52 = vld [vmem:[#allocation12 + $0x38] sm:$0xff]   ;;  %v2093_v53 = vld [vmem:[#allocation12 + $0x30] sm:$0xff]   ;;  %v2094_v42 = vld [vmem:[#allocation12 + $0x28] sm:$0xff]  }
 0x264   : > { %1887 = vmatprep.subr.bf16.mxu0 %v2092_v52  ;;  %1951 = vmatprep.subr.bf16.mxu1 %v2092_v52  ;;  %v2095_v54 = vld [vmem:[#allocation12 + $0x20] sm:$0xff]   ;;  %v1176_v55 = vld [vmem:[#allocation3 + $0x30] sm:$0xff]  ;;  %v2096_v61 = vld [vmem:[#allocation12 + $0x18] sm:$0xff]  }
 0x265   : > { %1888 = vmatpush3.bf16.msra.mxu0 %v2092_v52  ;;  %1959 = vmatpush3.bf16.msra.mxu1 %v2092_v52  ;;  %v1177_v56 = vld [vmem:[#allocation3] sm:$0xff]  ;;  %v2097_v62 = vld [vmem:[#allocation12 + $0x10] sm:$0xff]   ;;  %v2098_v63 = vld [vmem:[#allocation12 + $0x8] sm:$0xff]  }
 0x266   : > { %1889 = vmatprep.subr.bf16.mxu0 %v2093_v53  ;;  %1952 = vmatprep.subr.bf16.mxu1 %v2093_v53  ;;  %v1184_v57 = vld [vmem:[#allocation3 + $0x40] sm:$0xff]  ;;  %v1192_v58 = vpack.c.bf16 %v1177_v56, %v1176_v55  ;;  %v1178_v1 = vld [vmem:[#allocation3 + $0x58] sm:$0xff]  ;;  %v1186_v3 = vld [vmem:[#allocation3 + $0x10] sm:$0xff] }
 0x267   : > { %v1185_v59 = vld [vmem:[#allocation3 + $0x20] sm:$0xff]  ;;  %v1179_v2 = vld [vmem:[#allocation3 + $0x18] sm:$0xff]  ;;  %v1180_v5 = vld [vmem:[#allocation3 + $0x50] sm:$0xff] }
 0x268   : > { %v1196_v60 = vpack.c.bf16 %v1185_v59, %v1184_v57  ;;  %1903 = vmatprep.mubr.bf16.mxu0 %v1192_v58  ;;  %v2099_v0 = vld [vmem:[#allocation12] sm:$0xff]   ;;  %v1187_v4 = vld [vmem:[#allocation3 + $0x38] sm:$0xff]  ;;  %v1181_v6 = vld [vmem:[#allocation3 + $0x68] sm:$0xff]  ;;  %v1193_v9 = vpack.c.bf16 %v1179_v2, %v1178_v1 }
 0x269   : > { %1890 = vmatpush3.bf16.msra.mxu0 %v2093_v53  ;;  %1960 = vmatpush3.bf16.msra.mxu1 %v2093_v53  ;;  %v1188_v7 = vld [vmem:[#allocation3 + $0x60] sm:$0xff]  ;;  %v1189_v8 = vld [vmem:[#allocation3 + $0x70] sm:$0xff]  ;;  %v1197_v10 = vpack.c.bf16 %v1187_v4, %v1186_v3  ;;  %v1194_v11 = vpack.c.bf16 %v1181_v6, %v1180_v5  ;;  %v1182_v13 = vld [vmem:[#allocation3 + $0x8] sm:$0xff] }
 0x26a   : > { %1891 = vmatprep.subr.bf16.mxu0 %v2094_v42  ;;  %1953 = vmatprep.subr.bf16.mxu1 %v2094_v42  ;;  %v1198_v12 = vpack.c.bf16 %v1189_v8, %v1188_v7  ;;  %v1183_v14 = vld [vmem:[#allocation3 + $0x48] sm:$0xff]  ;;  %v1190_v15 = vld [vmem:[#allocation3 + $0x78] sm:$0xff] }
 0x26b   : > { %1911 = vmatprep.mubr.bf16.mxu1 %v1196_v60  ;;  %v1191_v17 = vld [vmem:[#allocation3 + $0x28] sm:$0xff]  ;;  %v1195_v18 = vpack.c.bf16 %v1183_v14, %v1182_v13 }
 0x26c   : > { %v1199_v19 = vpack.c.bf16 %v1191_v17, %v1190_v15 }
 0x26d   : > { %1892 = vmatpush3.bf16.msra.mxu0 %v2094_v42  ;;  %1961 = vmatpush3.bf16.msra.mxu1 %v2094_v42 }
 0x26e   : > { %1893 = vmatprep.subr.bf16.mxu0 %v2095_v54  ;;  %1954 = vmatprep.subr.bf16.mxu1 %v2095_v54 }
 0x271   : > { %1894 = vmatpush3.bf16.msra.mxu0 %v2095_v54  ;;  %1962 = vmatpush3.bf16.msra.mxu1 %v2095_v54 }
 0x272   : > { %1895 = vmatprep.subr.bf16.mxu0 %v2096_v61  ;;  %1955 = vmatprep.subr.bf16.mxu1 %v2096_v61 }
 0x275   : > { %1896 = vmatpush3.bf16.msra.mxu0 %v2096_v61  ;;  %1963 = vmatpush3.bf16.msra.mxu1 %v2096_v61 }
 0x276   : > { %1897 = vmatprep.subr.bf16.mxu0 %v2097_v62  ;;  %1956 = vmatprep.subr.bf16.mxu1 %v2097_v62 }
 0x279   : > { %1898 = vmatpush3.bf16.msra.mxu0 %v2097_v62  ;;  %1964 = vmatpush3.bf16.msra.mxu1 %v2097_v62 }
 0x27a   : > { %1899 = vmatprep.subr.bf16.mxu0 %v2098_v63  ;;  %1957 = vmatprep.subr.bf16.mxu1 %v2098_v63 }
 0x27d   : > { %1900 = vmatpush3.bf16.msra.mxu0 %v2098_v63  ;;  %1965 = vmatpush3.bf16.msra.mxu1 %v2098_v63 }
 0x27e   : > { %1901 = vmatprep.subr.bf16.mxu0 %v2099_v0  ;;  %1958 = vmatprep.subr.bf16.mxu1 %v2099_v0 }
 0x281   : > { %1902 = vmatpush3.bf16.msra.mxu0 %v2099_v0  ;;  %1966 = vmatpush3.bf16.msra.mxu1 %v2099_v0 }
 0x284   : > { %1904 = vmatmul.mubr.bf16.vlgmr.msra.gmra.mxu0 %v1193_v9  ;;  %1912 = vmatmul.mubr.bf16.vlgmr.msra.gmra.mxu1 %v1197_v10 }
 0x285   : > { %1907 = vmatprep.mubr.bf16.mxu0 %v1194_v11  ;;  %1915 = vmatprep.mubr.bf16.mxu1 %v1198_v12 }
 0x28c   : > { %1908 = vmatmul.mubr.bf16.gmra.mxu0 %v1195_v18  ;;  %1916 = vmatmul.mubr.bf16.gmra.mxu1 %v1199_v19 }
 0x344   : > { %v1905_v20 = vpop.f32.mrf.mxu0  ;;  %v1913_v22 = vpop.f32.mrf.mxu1 }
 0x345   : > { %1363 = vst [vmem:[#allocation14 + $0x10] sm:$0xff] %v1905_v20  ;;  %1371 = vst [vmem:[#allocation14 + $0x50] sm:$0xff] %v1913_v22 }
 0x346   : > { %v1298_v23 = vpop.f32.mrf.mxu0  ;;  %v1330_v16 = vpop.f32.mrf.mxu1 }
 0x347   : > { %1361 = vst [vmem:[#allocation14] sm:$0xff] %v1298_v23  ;;  %1369 = vst [vmem:[#allocation14 + $0x40] sm:$0xff] %v1330_v16 }
 0x348   : > { %v1906_v24 = vpop.f32.mrf.mxu0  ;;  %v1914_v25 = vpop.f32.mrf.mxu1 }
 0x349   : > { %1364 = vst [vmem:[#allocation14 + $0x18] sm:$0xff] %v1906_v24  ;;  %1372 = vst [vmem:[#allocation14 + $0x58] sm:$0xff] %v1914_v25 }
 0x34a   : > { %v1301_v26 = vpop.f32.mrf.mxu0  ;;  %v1333_v27 = vpop.f32.mrf.mxu1 }
 0x34b   : > { %1362 = vst [vmem:[#allocation14 + $0x8] sm:$0xff] %v1301_v26  ;;  %1370 = vst [vmem:[#allocation14 + $0x48] sm:$0xff] %v1333_v27 }
 0x34c   : > { %v1909_v28 = vpop.f32.mrf.mxu0  ;;  %v1917_v21 = vpop.f32.mrf.mxu1 }
 0x34d   : > { %1367 = vst [vmem:[#allocation14 + $0x30] sm:$0xff] %v1909_v28  ;;  %1375 = vst [vmem:[#allocation14 + $0x70] sm:$0xff] %v1917_v21 }
 0x34e   : > { %v1314_v29 = vpop.f32.mrf.mxu0  ;;  %v1346_v30 = vpop.f32.mrf.mxu1 }
 0x34f   : > { %1365 = vst [vmem:[#allocation14 + $0x20] sm:$0xff] %v1314_v29  ;;  %1373 = vst [vmem:[#allocation14 + $0x60] sm:$0xff] %v1346_v30 }
 0x350   : > { %v1910_v31 = vpop.f32.mrf.mxu0  ;;  %v1918_v32 = vpop.f32.mrf.mxu1 }
 0x351   : > { %1368 = vst [vmem:[#allocation14 + $0x38] sm:$0xff] %v1910_v31  ;;  %1376 = vst [vmem:[#allocation14 + $0x78] sm:$0xff] %v1918_v32 }
 0x352   : > { %v1317_v33 = vpop.f32.mrf.mxu0  ;;  %v1349_v34 = vpop.f32.mrf.mxu1 }
 0x353   : > { %1366 = vst [vmem:[#allocation14 + $0x28] sm:$0xff] %v1317_v33  ;;  %1374 = vst [vmem:[#allocation14 + $0x68] sm:$0xff] %v1349_v34 }
 0x354 PF: > { %p2023_p4 = scmp.eq.s32.totalorder %s2348_s26, 10  ;;  %s2294_s21 = smov [#allocation14]  }
 0x355   : > { %s1393_s8 = sshll.u32 %s2294_s21, 4  ;;  %s1394_s8 = int_to_ptr.vmem [resolvable:$true] %s1393_s8 }
 0x356   : > { %s2215_s9 = scalar_lea.vmem %s1394_s8, 2048  ;;  %s2221_s25 = scalar_lea.vmem %s1394_s8, 4096 }
 0x357   : > { %p2216_p12 = scmp.ne.s32.totalorder %s1394_s8, %s2215_s9  ;;  %p2222_p8 = scmp.lt.s32.totalorder %s1394_s8, %s1394_s8 }
 0x358   : > { %p2223_p5 = scmp.lt.s32.totalorder %s2221_s25, %s2215_s9 }
 0x359   : > { %p2217_p13 = pnand %p2216_p12, %p2023_p4 }
 0x35a   : > { %p2224_p9 = por %p2223_p5, %p2222_p8 }
 0x35b   : > { %p2218_p7 = pneg %p2217_p13 }
 0x35d   : > { %p2225_p3 = pnand %p2224_p9, %p2218_p7 }
 0x35f   : > { %2228 = shalt.err (!%p2225_p3)
}
 0x360   : > { %s2295_s29 = smov 128   ;;  %s2296_s7 = smov 8  }
 0x361   : > { %1988 = dma.vmem_to_hbm [thread:$0]  (%p2023_p4), %s1394_s8, 2048, %s2570_s6, [#allocation6], %s2295_s29, %s2295_s29, %s2296_s7  }
 0x362 PF: > { %p2024_p2 = scmp.ge.s32.totalorder %s2285_s23, 2  ;;  %p2025_p6 = scmp.eq.s32.totalorder %s1543_s27, 10 }
 0x364   : > { %p2009_p0 = pnand %p2025_p6, %p2024_p2 }
 0x366   : > { %p2010_p10 = pneg %p2009_p0 }
 0x368   : > { %2272 = dma.done.wait (%p2010_p10), [#allocation6], 2048  }
 0x369   : > { %2274 = vsyncadd (%p2010_p10), [#allocation6], 4294965248  ;;  %s27_s23 = sadd.s32 1, %s2285_s23   ;;  %s2574_s21 = smov %s2281_s22 }
 0x36a   : > { %p24_p11 = scmp.ge.s32.totalorder %s27_s23, 13   ;;  %s2575_s22 = smov %s2577_s30 }
 0x36c   :  { %26 = sbr.rel (!%p24_p11) target bundleno = 9 (0x9), region = 133 }
 0x371   :  { %1414 = vsyncpa [#allocation5], 1 }
 0x372   :  { %1416 = vsyncpa [#allocation5 + $0x1], 1 }
 0x373   :  { %1417 = vsyncpa [#allocation10], 1 }
 0x374   :  { %1419 = vsyncpa [#allocation10 + $0x1], 1 }
 0x375   :  { %1420 = vsyncpa [#allocation13], 1 }
 0x376   :  { %1421 = vsyncpa [#allocation6], 1 }
 0x377   :  { %1423 = vsyncpa [#allocation6 + $0x1], 1 }
 0x378   :  { %1424 = vsyncpa [#allocation7], 1 }
 0x379   :  { %1426 = vsyncpa [#allocation7 + $0x1], 1 }

</bundles_post_ra>
